<compile_context>
chip_gen: v5e
topology: v5e:2x2
jax: 0.10.0
libtpu: 0.0.40
codegen_flags: <defaults>
</compile_context>

<pallas_src>
import functools
import math

import jax
import jax.numpy as jnp
from jax.experimental import pallas as pl
from jax.experimental.pallas import tpu as pltpu


def _disc_jsd_partial_kernel(h_ref, c_ref, o_ref, m_sc, l_sc, sum_sc,
                             *, n_total, tile_rows, tiles_per_split):
    """Per-split (m, l, sum) partials for the rank-1 JSD discriminator loss.

    h_ref : (TN, n_h) native dtype — row tile of h_pl (cast to f32 in-kernel)
    c_ref : (1, n_h)  native dtype — summary vector (never materialized as (N, n_h))
    o_ref : (1, 8, 128) f32        — partials: [0,0,0]=m, [0,0,1]=l, [0,0,2]=sum(s)
    m_sc / l_sc / sum_sc : (1, 1) f32 VMEM running accumulators (per split / per core)
    """
    p = pl.program_id(0)          # parallel split (maps to a TensorCore on v7x)
    i = pl.program_id(1)          # row-tile index within the split ("arbitrary")

    @pl.when(i == 0)
    def _():
        # m seeded at 0: the reference logsumexp contains N exp(0) diagonal terms, so
        # 0 is always part of the global max; it also makes an empty split the exact
        # identity contribution (m=0, l=0, sum=0).
        m_sc[...] = jnp.zeros_like(m_sc)
        l_sc[...] = jnp.zeros_like(l_sc)
        sum_sc[...] = jnp.zeros_like(sum_sc)

    h = h_ref[...].astype(jnp.float32)            # cast in-kernel (no wrapper upcast)
    c = c_ref[...].astype(jnp.float32)            # (1, n_h)

    # rank-1: s[r] = <h[r], c>. dot_general contracting n_h leaves s lane-dense
    # (1, TN) instead of sublane-major (TN, 1), so exp/max/sum run on dense vregs.
    s = jax.lax.dot_general(
        c, h, dimension_numbers=(((1,), (1,)), ((), ())),
        preferred_element_type=jnp.float32)       # (1, TN)

    # Mask rows past n_total (partial last tile / clamped duplicate tile):
    # "-inf" for the logsumexp path, 0 for sum(s). (Zero-padding l would bias E_neg.)
    row0 = (p * tiles_per_split + i) * tile_rows  # UNCLAMPED global row of lane 0
    lane = jax.lax.broadcasted_iota(jnp.int32, s.shape, 1)
    valid = (row0 + lane) < n_total
    s_lse = jnp.where(valid, s, -1e30)
    s_sum = jnp.where(valid, s, 0.0)

    # Per-tile local reductions: depend only on this tile's data, NOT on the running
    # accumulators, so the heavy vector work overlaps the next tile's DMA.
    m_t = jnp.maximum(jnp.max(s_lse, keepdims=True), 0.0)   # (1, 1), >= 0
    l_t = jnp.sum(jnp.exp(s_lse - m_t), keepdims=True)      # (1, 1)
    sum_t = jnp.sum(s_sum, keepdims=True)                   # (1, 1)

    # Tiny scalar loop-carried combine (online logsumexp merge).
    m_old = m_sc[...]
    m_new = jnp.maximum(m_old, m_t)
    l_sc[...] = l_sc[...] * jnp.exp(m_old - m_new) + l_t * jnp.exp(m_t - m_new)
    sum_sc[...] = sum_sc[...] + sum_t
    m_sc[...] = m_new

    @pl.when(i == pl.num_programs(1) - 1)
    def _():
        sub = jax.lax.broadcasted_iota(jnp.int32, (8, 128), 0)
        ln = jax.lax.broadcasted_iota(jnp.int32, (8, 128), 1)
        blk = jnp.where((sub == 0) & (ln == 0), m_sc[...],
              jnp.where((sub == 0) & (ln == 1), l_sc[...],
              jnp.where((sub == 0) & (ln == 2), sum_sc[...], 0.0)))
        o_ref[...] = blk[None]


def discriminator_jsd_forward(c, h_pl, h_mi=None, s_bias1=None, s_bias2=None,
                              *, row_tile=8192, num_splits=2):
    """c: (1, n_h), h_pl: (1, N, n_h). h_mi / s_bias* unused (matches PyTorch forward)."""
    assert c.shape[0] == 1 and h_pl.shape[0] == 1, "reference semantics need B == 1"
    _, N, n_h = h_pl.shape
    assert N >= 2, "loss is degenerate for N < 2 (log(N*(N-1)))"

    h = h_pl[0]                   # (N, n_h) — native dtype, cast inside the kernel
    c_row = c                     # (1, n_h) — native dtype, never broadcast to (N, n_h)
    itemsize = jnp.dtype(h.dtype).itemsize

    # Row tile: as large as the VMEM budget allows (amortize ~0.35us/grid-step),
    # with the double-buffered h tile bounded to ~16 MiB so everything fits the
    # 32 MiB scoped limit on v5e/v6e/v7x.
    vmem_h_budget = 16 * 1024 * 1024
    max_rows = max(8, vmem_h_budget // (2 * n_h * itemsize))
    tn = max(8, (min(row_tile, max_rows) // 8) * 8)
    tn = min(tn, ((N + 7) // 8) * 8)              # never exceed (8-padded) N

    needed_tiles = pl.cdiv(N, tn)
    splits = num_splits if needed_tiles >= num_splits else 1   # leading "parallel" axis
    tiles_per_split = pl.cdiv(needed_tiles, splits)
    last_tile = needed_tiles - 1

    def h_index_map(p, i):
        # Clamp so over-allocated (p, i) pairs of an uneven split re-read an in-bounds
        # tile; the in-kernel row mask (from the UNCLAMPED index) zeroes their effect.
        t = p * tiles_per_split + i
        return (jnp.minimum(t, last_tile), 0)

    kernel = functools.partial(
        _disc_jsd_partial_kernel,
        n_total=N, tile_rows=tn, tiles_per_split=tiles_per_split)

    parts = pl.pallas_call(
        kernel,
        out_shape=jax.ShapeDtypeStruct((splits, 8, 128), jnp.float32),
        grid=(splits, tiles_per_split),
        in_specs=[
            pl.BlockSpec((tn, n_h), h_index_map),          # row tile of h (native dtype)
            pl.BlockSpec((1, n_h), lambda p, i: (0, 0)),   # c, reused every step
        ],
        out_specs=pl.BlockSpec((1, 8, 128), lambda p, i: (p, 0, 0)),
        scratch_shapes=[
            pltpu.VMEM((1, 1), jnp.float32),   # running max      m
            pltpu.VMEM((1, 1), jnp.float32),   # running sum-exp  l
            pltpu.VMEM((1, 1), jnp.float32),   # running sum(s)   (for E_pos)
        ],
        compiler_params=pltpu.CompilerParams(
            dimension_semantics=("parallel", "arbitrary"),
            vmem_limit_bytes=32 * 1024 * 1024,
        ),
        cost_estimate=pl.CostEstimate(
            flops=2 * N * n_h,
            transcendentals=N,
            bytes_accessed=N * n_h * itemsize + n_h * itemsize + splits * 8 * 128 * 4,
        ),
    )(h, c_row)

    # Tiny epilogue: merge per-split partials and finish the loss in plain JAX.
    m_p = parts[:, 0, 0]
    l_p = parts[:, 0, 1]
    s_p = parts[:, 0, 2]
    n = float(N)
    m_g = jnp.maximum(jnp.max(m_p), 0.0)
    l_g = jnp.sum(l_p * jnp.exp(m_p - m_g))
    e_pos = jnp.sum(s_p) / n
    # reference logsumexp over {s_r repeated (N-1) times} U {0 repeated N times}
    lse = m_g + jnp.log((n - 1.0) * l_g + n * jnp.exp(-m_g))
    e_neg = lse - math.log(n * (n - 1.0))
    return e_pos - e_neg                           # loss = -E_neg + E_pos


def _reference_forward(c, h_pl):
    """Plain-JAX transcription of the PyTorch forward (B == 1) for validation."""
    _, N, n_h = h_pl.shape
    c_x = jnp.broadcast_to(c[:, None, :], h_pl.shape)             # (1, N, n_h)
    u = jnp.einsum("bid,bjd->bij", h_pl.astype(jnp.float32),
                   c_x.astype(jnp.float32))[0]                    # (N, N)
    mask = jnp.eye(N, dtype=jnp.float32)
    n_mask = 1.0 - mask
    e_pos = jnp.sum(u * mask) / jnp.sum(mask)
    e_neg = jax.scipy.special.logsumexp(u * n_mask) - jnp.log(jnp.sum(n_mask))
    return -e_neg + e_pos


if __name__ == "__main__":
    key = jax.random.PRNGKey(0)
    k_w, k_c, k_pl, k_mi, k_c2, k_pl2 = jax.random.split(key, 6)

    n_h = 32   # hidden size (Bilinear(n_h, n_h, 1))
    N = 16     # number of nodes
    B = 1      # batch (required for the u.squeeze() -> (N, N) semantics)

    # nn.Bilinear(n_h, n_h, 1) parameters: xavier_uniform weight, zero bias.
    # Declared by __init__ but never used in forward() — kept for fidelity.
    limit = math.sqrt(6.0 / (n_h * n_h + n_h))
    f_k_weight = jax.random.uniform(k_w, (1, n_h, n_h), jnp.float32, -limit, limit)
    f_k_bias = jnp.zeros((1,), jnp.float32)

    c = jax.random.normal(k_c, (B, n_h), jnp.float32)
    h_pl = jax.random.normal(k_pl, (B, N, n_h), jnp.float32)
    h_mi = jax.random.normal(k_mi, (B, N, n_h), jnp.float32)   # unused by forward

    loss = jax.block_until_ready(discriminator_jsd_forward(c, h_pl, h_mi))
    ref = jax.block_until_ready(_reference_forward(c, h_pl))
    if not jnp.allclose(loss, ref, rtol=1e-5, atol=1e-4):
        raise AssertionError(f"mismatch (single tile): kernel={loss}, ref={ref}")

    # Second config: ragged N (not a multiple of the row tile) — exercises the masked
    # partial tile, the multi-tile online logsumexp, and the 2-way parallel split.
    N2, n_h2 = 300, 64
    c2 = jax.random.normal(k_c2, (B, n_h2), jnp.float32)
    h_pl2 = jax.random.normal(k_pl2, (B, N2, n_h2), jnp.float32)
    loss2 = jax.block_until_ready(discriminator_jsd_forward(c2, h_pl2, row_tile=128))
    ref2 = jax.block_until_ready(_reference_forward(c2, h_pl2))
    if not jnp.allclose(loss2, ref2, rtol=1e-5, atol=1e-4):
        raise AssertionError(f"mismatch (masked tiles): kernel={loss2}, ref={ref2}")

    print("KERNEL_OK")
</pallas_src>

<mosaic_0001>
module attributes {stable_mosaic.version = 11 : i64} {
  func.func @_disc_jsd_partial_kernel(%arg0: i32, %arg1: i32, %arg2: memref<16x32xf32, #tpu.memory_space<vmem>>, %arg3: memref<1x32xf32, #tpu.memory_space<vmem>>, %arg4: memref<1x8x128xf32, #tpu.memory_space<vmem>>, %arg5: memref<1x1xf32, #tpu.memory_space<vmem>>, %arg6: memref<1x1xf32, #tpu.memory_space<vmem>>, %arg7: memref<1x1xf32, #tpu.memory_space<vmem>>) attributes {dimension_semantics = [#tpu.dimension_semantics<parallel>, #tpu.dimension_semantics<arbitrary>], iteration_bounds = array<i64: 1, 1>, scalar_prefetch = 0 : i64, scratch_operands = 3 : i64, tpu.core_type = #tpu.core_type<tc>, window_params = [{transform_indices = @transform_0, window_bounds = array<i64: 16, 32>}, {pipeline_mode = #tpu.pipeline_mode<synchronous>, transform_indices = @transform_1, window_bounds = array<i64: 1, 32>}, {transform_indices = @transform_2, window_bounds = array<i64: 1, 8, 128>}]} {
    %c0_i32 = arith.constant 0 : i32
    %0 = arith.cmpi eq, %arg1, %c0_i32 : i32
    %1 = arith.extui %0 : i1 to i32
    %c0_i32_0 = arith.constant 0 : i32
    %2 = arith.cmpi ne, %1, %c0_i32_0 : i32
    scf.if %2 {
      %cst_25 = arith.constant 0.000000e+00 : f32
      %56 = vector.broadcast %cst_25 : f32 to vector<1x1xf32>
      %c0_26 = arith.constant 0 : index
      %c0_27 = arith.constant 0 : index
      %57 = vector.load %arg5[%c0_26, %c0_27] : memref<1x1xf32, #tpu.memory_space<vmem>>, vector<1x1xf32>
      tpu.vector_store %arg5[%c0_26, %c0_27], %56 {strides = array<i32>} : memref<1x1xf32, #tpu.memory_space<vmem>>, vector<1x1xf32>,
      %cst_28 = arith.constant 0.000000e+00 : f32
      %58 = vector.broadcast %cst_28 : f32 to vector<1x1xf32>
      %c0_29 = arith.constant 0 : index
      %c0_30 = arith.constant 0 : index
      %59 = vector.load %arg6[%c0_29, %c0_30] : memref<1x1xf32, #tpu.memory_space<vmem>>, vector<1x1xf32>
      tpu.vector_store %arg6[%c0_29, %c0_30], %58 {strides = array<i32>} : memref<1x1xf32, #tpu.memory_space<vmem>>, vector<1x1xf32>,
      %cst_31 = arith.constant 0.000000e+00 : f32
      %60 = vector.broadcast %cst_31 : f32 to vector<1x1xf32>
      %c0_32 = arith.constant 0 : index
      %c0_33 = arith.constant 0 : index
      %61 = vector.load %arg7[%c0_32, %c0_33] : memref<1x1xf32, #tpu.memory_space<vmem>>, vector<1x1xf32>
      tpu.vector_store %arg7[%c0_32, %c0_33], %60 {strides = array<i32>} : memref<1x1xf32, #tpu.memory_space<vmem>>, vector<1x1xf32>,
    } else {
    }
    %c0 = arith.constant 0 : index
    %c0_1 = arith.constant 0 : index
    %3 = vector.load %arg2[%c0, %c0_1] : memref<16x32xf32, #tpu.memory_space<vmem>>, vector<16x32xf32>
    %c0_2 = arith.constant 0 : index
    %c0_3 = arith.constant 0 : index
    %4 = vector.load %arg3[%c0_2, %c0_3] : memref<1x32xf32, #tpu.memory_space<vmem>>, vector<1x32xf32>
    %cst = arith.constant dense<0.000000e+00> : vector<1x16xf32>
    %5 = tpu.matmul %4, %3, %cst {dimension_numbers = #tpu.dot_dimension_numbers<[1], [1], [0], [0], [0, 0, 1, 0], [], []>} : vector<1x32xf32>, vector<16x32xf32>, vector<1x16xf32> -> vector<1x16xf32>
    %c1_i32 = arith.constant 1 : i32
    %6 = arith.muli %arg0, %c1_i32 : i32
    %7 = arith.addi %6, %arg1 : i32
    %c16_i32 = arith.constant 16 : i32
    %8 = arith.muli %7, %c16_i32 : i32
    %9 = tpu.iota {dimensions = array<i32: 1>} : vector<1x16xi32>
    %10 = vector.broadcast %8 : i32 to vector<1x16xi32>
    %11 = arith.addi %10, %9 : vector<1x16xi32>
    %c16_i32_4 = arith.constant 16 : i32
    %12 = vector.broadcast %c16_i32_4 : i32 to vector<1x16xi32>
    %13 = arith.cmpi slt, %11, %12 : vector<1x16xi32>
    %cst_5 = arith.constant -1.000000e+30 : f32
    %14 = vector.broadcast %cst_5 : f32 to vector<1x16xf32>
    %15 = arith.select %13, %5, %14 : vector<1x16xi1>, vector<1x16xf32>
    %cst_6 = arith.constant 0.000000e+00 : f32
    %16 = vector.broadcast %cst_6 : f32 to vector<1x16xf32>
    %17 = arith.select %13, %5, %16 : vector<1x16xi1>, vector<1x16xf32>
    %18 = vector.shape_cast %15 : vector<1x16xf32> to vector<1x1x16xf32>
    %cst_7 = arith.constant dense<0xFF800000> : vector<1xf32>
    %19 = vector.multi_reduction <maximumf>, %18, %cst_7 [1, 2] : vector<1x1x16xf32> to vector<1xf32>
    %20 = vector.shape_cast %19 : vector<1xf32> to vector<1x1x1xf32>
    %21 = vector.extract %20[0, 0, 0] : f32 from vector<1x1x1xf32>
    %22 = vector.broadcast %21 : f32 to vector<1x1xf32>
    %cst_8 = arith.constant 0.000000e+00 : f32
    %23 = vector.broadcast %cst_8 : f32 to vector<1x1xf32>
    %24 = arith.maximumf %22, %23 : vector<1x1xf32>
    %25 = vector.broadcast %24 : vector<1x1xf32> to vector<1x16xf32>
    %26 = arith.subf %15, %25 : vector<1x16xf32>
    %27 = math.exp %26 : vector<1x16xf32>
    %28 = vector.shape_cast %27 : vector<1x16xf32> to vector<1x1x16xf32>
    %cst_9 = arith.constant dense<0.000000e+00> : vector<1xf32>
    %29 = vector.multi_reduction <add>, %28, %cst_9 [1, 2] : vector<1x1x16xf32> to vector<1xf32>
    %30 = vector.shape_cast %29 : vector<1xf32> to vector<1x1x1xf32>
    %31 = vector.extract %30[0, 0, 0] : f32 from vector<1x1x1xf32>
    %32 = vector.broadcast %31 : f32 to vector<1x1xf32>
    %33 = vector.shape_cast %17 : vector<1x16xf32> to vector<1x1x16xf32>
    %cst_10 = arith.constant dense<0.000000e+00> : vector<1xf32>
    %34 = vector.multi_reduction <add>, %33, %cst_10 [1, 2] : vector<1x1x16xf32> to vector<1xf32>
    %35 = vector.shape_cast %34 : vector<1xf32> to vector<1x1x1xf32>
    %36 = vector.extract %35[0, 0, 0] : f32 from vector<1x1x1xf32>
    %37 = vector.broadcast %36 : f32 to vector<1x1xf32>
    %c0_11 = arith.constant 0 : index
    %c0_12 = arith.constant 0 : index
    %38 = vector.load %arg5[%c0_11, %c0_12] : memref<1x1xf32, #tpu.memory_space<vmem>>, vector<1x1xf32>
    %39 = arith.maximumf %38, %24 : vector<1x1xf32>
    %c0_13 = arith.constant 0 : index
    %c0_14 = arith.constant 0 : index
    %40 = vector.load %arg6[%c0_13, %c0_14] : memref<1x1xf32, #tpu.memory_space<vmem>>, vector<1x1xf32>
    %41 = arith.subf %38, %39 : vector<1x1xf32>
    %42 = math.exp %41 : vector<1x1xf32>
    %43 = arith.mulf %40, %42 : vector<1x1xf32>
    %44 = arith.subf %24, %39 : vector<1x1xf32>
    %45 = math.exp %44 : vector<1x1xf32>
    %46 = arith.mulf %32, %45 : vector<1x1xf32>
    %47 = arith.addf %43, %46 : vector<1x1xf32>
    %c0_15 = arith.constant 0 : index
    %c0_16 = arith.constant 0 : index
    %48 = vector.load %arg6[%c0_15, %c0_16] : memref<1x1xf32, #tpu.memory_space<vmem>>, vector<1x1xf32>
    tpu.vector_store %arg6[%c0_15, %c0_16], %47 {strides = array<i32>} : memref<1x1xf32, #tpu.memory_space<vmem>>, vector<1x1xf32>,
    %c0_17 = arith.constant 0 : index
    %c0_18 = arith.constant 0 : index
    %49 = vector.load %arg7[%c0_17, %c0_18] : memref<1x1xf32, #tpu.memory_space<vmem>>, vector<1x1xf32>
    %50 = arith.addf %49, %37 : vector<1x1xf32>
    %c0_19 = arith.constant 0 : index
    %c0_20 = arith.constant 0 : index
    %51 = vector.load %arg7[%c0_19, %c0_20] : memref<1x1xf32, #tpu.memory_space<vmem>>, vector<1x1xf32>
    tpu.vector_store %arg7[%c0_19, %c0_20], %50 {strides = array<i32>} : memref<1x1xf32, #tpu.memory_space<vmem>>, vector<1x1xf32>,
    %c0_21 = arith.constant 0 : index
    %c0_22 = arith.constant 0 : index
    %52 = vector.load %arg5[%c0_21, %c0_22] : memref<1x1xf32, #tpu.memory_space<vmem>>, vector<1x1xf32>
    tpu.vector_store %arg5[%c0_21, %c0_22], %39 {strides = array<i32>} : memref<1x1xf32, #tpu.memory_space<vmem>>, vector<1x1xf32>,
    %c0_i32_23 = arith.constant 0 : i32
    %53 = arith.cmpi eq, %arg1, %c0_i32_23 : i32
    %54 = arith.extui %53 : i1 to i32
    %c0_i32_24 = arith.constant 0 : i32
    %55 = arith.cmpi ne, %54, %c0_i32_24 : i32
    scf.if %55 {
      %56 = tpu.iota {dimensions = array<i32: 0>} : vector<8x128xi32>
      %57 = tpu.iota {dimensions = array<i32: 1>} : vector<8x128xi32>
      %c0_i32_25 = arith.constant 0 : i32
      %58 = vector.broadcast %c0_i32_25 : i32 to vector<8x128xi32>
      %59 = arith.cmpi eq, %56, %58 : vector<8x128xi32>
      %c0_i32_26 = arith.constant 0 : i32
      %60 = vector.broadcast %c0_i32_26 : i32 to vector<8x128xi32>
      %61 = arith.cmpi eq, %57, %60 : vector<8x128xi32>
      %62 = arith.andi %59, %61 : vector<8x128xi1>
      %c0_27 = arith.constant 0 : index
      %c0_28 = arith.constant 0 : index
      %63 = vector.load %arg5[%c0_27, %c0_28] : memref<1x1xf32, #tpu.memory_space<vmem>>, vector<1x1xf32>
      %c0_i32_29 = arith.constant 0 : i32
      %64 = vector.broadcast %c0_i32_29 : i32 to vector<8x128xi32>
      %65 = arith.cmpi eq, %56, %64 : vector<8x128xi32>
      %c1_i32_30 = arith.constant 1 : i32
      %66 = vector.broadcast %c1_i32_30 : i32 to vector<8x128xi32>
      %67 = arith.cmpi eq, %57, %66 : vector<8x128xi32>
      %68 = arith.andi %65, %67 : vector<8x128xi1>
      %c0_31 = arith.constant 0 : index
      %c0_32 = arith.constant 0 : index
      %69 = vector.load %arg6[%c0_31, %c0_32] : memref<1x1xf32, #tpu.memory_space<vmem>>, vector<1x1xf32>
      %c0_i32_33 = arith.constant 0 : i32
      %70 = vector.broadcast %c0_i32_33 : i32 to vector<8x128xi32>
      %71 = arith.cmpi eq, %56, %70 : vector<8x128xi32>
      %c2_i32 = arith.constant 2 : i32
      %72 = vector.broadcast %c2_i32 : i32 to vector<8x128xi32>
      %73 = arith.cmpi eq, %57, %72 : vector<8x128xi32>
      %74 = arith.andi %71, %73 : vector<8x128xi1>
      %c0_34 = arith.constant 0 : index
      %c0_35 = arith.constant 0 : index
      %75 = vector.load %arg7[%c0_34, %c0_35] : memref<1x1xf32, #tpu.memory_space<vmem>>, vector<1x1xf32>
      %cst_36 = arith.constant 0.000000e+00 : f32
      %76 = vector.shape_cast %75 : vector<1x1xf32> to vector<1x1xf32>
      %77 = vector.broadcast %76 : vector<1x1xf32> to vector<8x128xf32>
      %78 = vector.broadcast %cst_36 : f32 to vector<8x128xf32>
      %79 = arith.select %74, %77, %78 : vector<8x128xi1>, vector<8x128xf32>
      %80 = vector.shape_cast %69 : vector<1x1xf32> to vector<1x1xf32>
      %81 = vector.broadcast %80 : vector<1x1xf32> to vector<8x128xf32>
      %82 = arith.select %68, %81, %79 : vector<8x128xi1>, vector<8x128xf32>
      %83 = vector.shape_cast %63 : vector<1x1xf32> to vector<1x1xf32>
      %84 = vector.broadcast %83 : vector<1x1xf32> to vector<8x128xf32>
      %85 = arith.select %62, %84, %82 : vector<8x128xi1>, vector<8x128xf32>
      %86 = vector.shape_cast %85 : vector<8x128xf32> to vector<1x8x128xf32>
      %c0_37 = arith.constant 0 : index
      %c0_38 = arith.constant 0 : index
      %c0_39 = arith.constant 0 : index
      %87 = vector.load %arg4[%c0_37, %c0_38, %c0_39] : memref<1x8x128xf32, #tpu.memory_space<vmem>>, vector<1x8x128xf32>
      tpu.vector_store %arg4[%c0_37, %c0_38, %c0_39], %86 {strides = array<i32>} : memref<1x8x128xf32, #tpu.memory_space<vmem>>, vector<1x8x128xf32>,
    } else {
    }
    return
  }
  func.func @transform_0(%arg0: i32, %arg1: i32) -> (i32, i32) {
    %c1_i32 = arith.constant 1 : i32
    %0 = arith.muli %arg0, %c1_i32 : i32
    %1 = arith.addi %0, %arg1 : i32
    %c0_i32 = arith.constant 0 : i32
    %2 = arith.minsi %1, %c0_i32 : i32
    %c0_i32_0 = arith.constant 0 : i32
    %c0_i32_1 = arith.constant 0 : i32
    return %2, %c0_i32_0 : i32, i32
  }
  func.func @transform_1(%arg0: i32, %arg1: i32) -> (i32, i32) {
    %c0_i32 = arith.constant 0 : i32
    %c0_i32_0 = arith.constant 0 : i32
    %c0_i32_1 = arith.constant 0 : i32
    return %c0_i32, %c0_i32_0 : i32, i32
  }
  func.func @transform_2(%arg0: i32, %arg1: i32) -> (i32, i32, i32) {
    %c0_i32 = arith.constant 0 : i32
    %c0_i32_0 = arith.constant 0 : i32
    %c0_i32_1 = arith.constant 0 : i32
    return %arg0, %c0_i32, %c0_i32_0 : i32, i32, i32
  }
}

</mosaic_0001>

<bundles_post_ra>
// kernel: tpu_custom_call.1
= control target key start
LH: loop header
LB: loop body
LE: loop exit
PB: predicated region body
PF: predicated region fallthrough
CT: control target
= control target key end

     0   :  { %7 = vsyncpa [#allocation6], 0  ;;  %s369_s0 = inlined_call_operand.hbm [shape: f32[16,32], index: 0, kind: input, shape index: {}]   ;;  %s370_s1 = inlined_call_operand.hbm [shape: f32[1,32], index: 1, kind: input, shape index: {}]   ;;  %s371_s2 = inlined_call_operand.hbm [shape: f32[1,8,128], index: 2, kind: output, shape index: {}]  }
   0x1   :  { %8 = vsyncpa [#allocation9], 0 }
   0x2   :  { %9 = vsyncpa [#allocation7], 0  ;;  %s20_s11 = sshll.u32 %s369_s0, 4  ;;  %s321_s12 = smov [#allocation5]   ;;  %s21_s11 = int_to_ptr.hbm [resolvable:$true] %s20_s11 }
   0x3   :  { %s22_s13 = sshll.u32 %s321_s12, 4  ;;  %s34_s16 = sshll.u32 %s370_s1, 4  ;;  %s23_s13 = int_to_ptr.vmem [resolvable:$true] %s22_s13  ;;  %s35_s16 = int_to_ptr.hbm [resolvable:$true] %s34_s16 }
   0x4   :  { %s322_s17 = smov 128   ;;  %s323_s18 = smov 8  }
   0x5   :  { %28 = dma.hbm_to_vmem [thread:$0]  %s21_s11, 256, %s23_s13, [#allocation6], %s322_s17, %s322_s17, %s323_s18  }
   0x6   :  { %s324_s19 = smov [#allocation8]  }
   0x7   :  { %s36_s20 = sshll.u32 %s324_s19, 4  ;;  %s37_s20 = int_to_ptr.vmem [resolvable:$true] %s36_s20 }
   0x8   :  { %39 = dma.hbm_to_vmem [thread:$0]  %s35_s16, 16, %s37_s20, [#allocation9]  }
   0x9   :  { %315 = dma.done.wait [#allocation6], 256  }
   0xa   :  { %316 = vsyncadd [#allocation6], 4294967040 }
   0xb   :  { %317 = dma.done.wait [#allocation9], 16  }
   0xc   :  { %318 = vsyncadd [#allocation9], 4294967280  ;;  %vm63_vm0 = vcmask 261120   ;;  %v61_v0 = vld [vmem:[#allocation5 + $0x8] sm:$0xff]  ;;  %v60_v1 = vld [vmem:[#allocation5] sm:$0xff]  ;;  %v95_v3 = vlaneseq  ;;  %vm102_vm2 = vcmask 122880  }
   0xd   :  { %215 = vmatpush.xpose.msk.msra.mxu0 %vm63_vm0, %v61_v0  ;;  %v62_v2 = vld [vmem:[#allocation8] sm:$0x1]  ;;  %vm56_vm3 = vcmask 0   ;;  %v325_v10 = vmov 0.0   ;;  %v326_v42 = vmov 0   ;;  %s327_s22 = smov [#allocation10]  }
   0xe   :  { %v350_v4 = vand.u32 127, %v95_v3  ;;  %57 = vst.msk [vmem:[#allocation2] sm:$0x1] %vm56_vm3, %v325_v10  ;;  %231 = vset.pattern.permute.xlu1 %v326_v42  ;;  %232 = vset.pattern.permute.xlu2 %v326_v42  ;;  %v162_v58 = vshrl.u32 %v95_v3, 7  ;;  %s200_s23 = sshll.u32 %s327_s22, 4  ;;  %s202_s26 = sshll.u32 %s371_s2, 4  ;;  %s201_s23 = int_to_ptr.vmem [resolvable:$true] %s200_s23  ;;  %s203_s26 = int_to_ptr.hbm [resolvable:$true] %s202_s26 }
   0xf   :  { %58 = vst.msk [vmem:[#allocation3] sm:$0x1] %vm56_vm3, %v325_v10  ;;  %233 = vset.pattern.permute.xlu0 %v326_v42 }
  0x10   :  { %vm99_vm1 = vcmp.lt.s32.totalorder %v350_v4, 16  ;;  %59 = vst.msk [vmem:[#allocation4] sm:$0x1] %vm56_vm3, %v325_v10  ;;  %vm163_vm4 = vcmp.eq.s32.totalorder %v162_v58, 0  ;;  %vm170_vm5 = vcmp.eq.s32.totalorder %v350_v4, 2  ;;  %vm167_vm6 = vcmp.eq.s32.totalorder %v350_v4, 1 }
  0x11   :  { %216 = vmatpush.xpose.msk.msra.mxu0 %vm63_vm0, %v60_v1  ;;  %vm164_vm7 = vcmp.eq.s32.totalorder %v350_v4, 0  ;;  %vm171_vm8 = vmand %vm163_vm4, %vm170_vm5 }
  0x12   :  { %vm168_vm9 = vmand %vm163_vm4, %vm167_vm6 }
  0x13   :  { %vm165_vm10 = vmand %vm163_vm4, %vm164_vm7 }
  0x14   :  { %217 = vmatmul.msk.f32.vlgmr.msra.gmra.mxu0 %vm63_vm0, %v62_v2 }
  0x15   :  { %v140_v19 = vld [vmem:[#allocation2] sm:$0x1] }
  0x16   :  { %v142_v46 = vld [vmem:[#allocation3] sm:$0x1] }
  0x17   :  { %v154_v47 = vld [vmem:[#allocation4] sm:$0x1] }
  0x91   :  { %v90_v5 = vpop.f32.mrf.mxu0 }
  0x92   :  { %v100_v6 = vsel %vm99_vm1, %v90_v5, -1e+30  ;;  %v101_v7 = vsel %vm99_vm1, %v90_v5, 0.0 }
  0x93   :  { %v129_v8 = vsel %vm102_vm2, %v101_v7, 0.0  ;;  %v103_v9 = vsel %vm102_vm2, %v100_v6, -inf }
  0x94   :  { %130 = vadd.xlane.f32.xlu1 %v129_v8  ;;  %104 = vmax.xlane.f32.xlu0 %v103_v9 }
 0x107   :  { %v105_v11 = vpop.xlane.xlu0 %104  ;;  %v131_v28 = vpop.xlane.xlu1 %130 }
 0x108   :  { %v106_v12 = vrot.slane %v105_v11, 4  ;;  %v132_v29 = vrot.slane %v131_v28, 4 }
 0x10a   :  { %v107_v13 = vmax.f32 %v105_v11, %v106_v12  ;;  %v133_v30 = vadd.f32 %v132_v29, %v131_v28 }
 0x10c   :  { %v108_v14 = vrot.slane %v107_v13, 2  ;;  %v134_v31 = vrot.slane %v133_v30, 2 }
 0x10e   :  { %v109_v15 = vmax.f32 %v107_v13, %v108_v14  ;;  %v135_v35 = vadd.f32 %v134_v31, %v133_v30 }
 0x110   :  { %v110_v16 = vrot.slane %v109_v15, 1  ;;  %v136_v38 = vrot.slane %v135_v35, 1 }
 0x112   :  { %v111_v17 = vmax.f32 %v109_v15, %v110_v16  ;;  %v137_v41 = vadd.f32 %v136_v38, %v135_v35 }
 0x114   :  { %218 = vpush %v111_v17 }
 0x145   :  { %s219_s0 = spop %218 }
 0x146   :  { %v113_v18 = vstv %s219_s0 }
 0x147   :  { %v114_v20 = vmax.f32 %v113_v18, 0.0 }
 0x149   :  { %v115_v21 = vsub.f32 %v100_v6, %v114_v20  ;;  %v141_v22 = vmax.f32 %v140_v19, %v114_v20 }
 0x14b   :  { %v116_v23 = vmul.f32 1.442695, %v115_v21  ;;  %v143_v24 = vsub.f32 %v140_v19, %v141_v22  ;;  %v147_v25 = vsub.f32 %v114_v20, %v141_v22  ;;  %157 = vst.msk [vmem:[#allocation2] sm:$0x1] %vm56_vm3, %v141_v22 }
 0x14d   :  { %237 = vpow2.f32 %v116_v23  ;;  %v144_v43 = vmul.f32 1.442695, %v143_v24  ;;  %v148_v44 = vmul.f32 1.442695, %v147_v25 }
 0x14f   :  { %239 = vpow2.f32 %v144_v43 }
 0x150   :  { %241 = vpow2.f32 %v148_v44 }
 0x152   :  { %v236_v57 = vld [vmem:[#allocation2] ss:$0 sm:$0xff] }
 0x153   :  { %v238_v26 = vpop.eup %237 }
 0x154   :  { %v118_v27 = vsel %vm102_vm2, %v238_v26, 0.0 }
 0x155   :  { %119 = vadd.xlane.f32.xlu0 %v118_v27  ;;  %v240_v45 = vpop.eup %239 }
 0x156   :  { %v242_v48 = vpop.eup %241  ;;  %v146_v50 = vmul.f32 %v240_v45, %v142_v46 }
 0x1c8   :  { %v120_v32 = vpop.xlane.xlu0 %119 }
 0x1c9   :  { %v121_v33 = vrot.slane %v120_v32, 4 }
 0x1cb   :  { %v122_v34 = vadd.f32 %v121_v33, %v120_v32 }
 0x1cd   :  { %v123_v36 = vrot.slane %v122_v34, 2 }
 0x1cf   :  { %v124_v37 = vadd.f32 %v123_v36, %v122_v34 }
 0x1d1   :  { %v125_v39 = vrot.slane %v124_v37, 1 }
 0x1d3   :  { %v126_v40 = vadd.f32 %v125_v39, %v124_v37 }
 0x1d5   :  { %220 = vpush %v126_v40 }
 0x1d6   :  { %222 = vpush %v137_v41 }
 0x206   :  { %s221_s1 = spop %220 }
 0x207   :  { %v128_v49 = vstv %s221_s1  ;;  %s223_s21 = spop %222 }
 0x208   :  { %v150_v51 = vmul.f32 %v242_v48, %v128_v49  ;;  %v139_v52 = vstv %s223_s21 }
 0x209   :  { %v155_v53 = vadd.f32 %v154_v47, %v139_v52 }
 0x20a   :  { %v151_v54 = vadd.f32 %v150_v51, %v146_v50 }
 0x20b   :  { %156 = vst.msk [vmem:[#allocation4] sm:$0x1] %vm56_vm3, %v155_v53 }
 0x20c   :  { %153 = vst.msk [vmem:[#allocation3] sm:$0x1] %vm56_vm3, %v151_v54 }
 0x212   :  { %v234_v55 = vld [vmem:[#allocation4] ss:$0 sm:$0xff] }
 0x213   :  { %v235_v56 = vld [vmem:[#allocation3] ss:$0 sm:$0xff]  ;;  %176 = vperm.xlu1 %231, %v234_v55  }
 0x214   :  { %183 = vperm.xlu2 %232, %v235_v56  }
 0x21c   :  { %190 = vperm.xlu2 %232, %v236_v57  }
 0x26e   :  { %v184_v59 = vpop.permute.xlu2 %183 }
 0x276   :  { %v191_v62 = vpop.permute.xlu2 %190 }
 0x285   :  { %v177_v60 = vpop.permute.xlu1 %176 }
 0x286   :  { %v179_v61 = vsel %vm171_vm8, %v177_v60, 0.0 }
 0x287   :  { %v186_v63 = vsel %vm168_vm9, %v184_v59, %v179_v61 }
 0x288   :  { %v193_v0 = vsel %vm165_vm10, %v191_v62, %v186_v63 }
 0x289   :  { %194 = vst [vmem:[#allocation10] sm:$0xff] %v193_v0 }
 0x28a   :  { %205 = dma.vmem_to_hbm [thread:$0]  %s201_s23, 128, %s203_s26, [#allocation7]  }
 0x28b   :  { %319 = dma.done.wait [#allocation7], 128  }
 0x28c   :  { %320 = vsyncadd [#allocation7], 4294967168 }
 0x28d   :  { %210 = vsyncpa [#allocation6], 1 }
 0x28e   :  { %211 = vsyncpa [#allocation9], 1 }
 0x28f   :  { %212 = vsyncpa [#allocation7], 1 }

</bundles_post_ra>
